<compile_context>
chip_gen: v6e
topology: v6e:2x2x1
jax: 0.10.0
libtpu: 0.0.40
codegen_flags: <defaults>
</compile_context>

<pallas_src>
import jax
import jax.numpy as jnp
from jax.experimental import pallas as pl
from jax.experimental.pallas import tpu as pltpu

_MIB = 1024 * 1024
_XLA_FALLBACK_CUTOFF = 4096  # B * E below this -> plain XLA dot is faster than a pallas_call


# ----------------------------------------------------------------------------- helpers
def _round_up(x: int, m: int) -> int:
    return ((x + m - 1) // m) * m


def _cdiv(a: int, b: int) -> int:
    return -(-a // b)


def _vmem_limit_bytes() -> int:
    """Generation-aware scoped-VMEM request (leaves headroom vs. physical VMEM)."""
    cap = 128 * _MIB
    try:
        info = pltpu.get_tpu_info()
        cap = int(getattr(info, "vmem_capacity_bytes", cap))
    except Exception:
        pass
    if cap <= 64 * _MIB:          # v7x-class TensorCore: 64 MiB physical VMEM
        return 24 * _MIB
    return 28 * _MIB              # v5e / v6e: 128 MiB physical VMEM


def _plan_n_tiling(K: int, E: int, w_itemsize: int, budget: int):
    """Choose (Np, tn) so the weight slab(s) fit in ~half the VMEM budget."""
    Np0 = _round_up(E, 128)
    half = budget // 2
    if K * Np0 * w_itemsize <= half:        # single resident slab, 1 buffer
        return Np0, Np0
    tn = Np0
    while tn > 128 and 2 * K * tn * w_itemsize > half:   # N-tiled -> double-buffered
        tn = _round_up(tn // 2, 128)
    Np = _round_up(Np0, tn)                 # make tn divide Np exactly
    return Np, tn


def _pick_tm(B: int, K: int, tn: int, n_j: int, budget: int,
             x_itemsize: int, w_itemsize: int) -> int:
    """Batch tile: big enough to pipeline, >= ~4 grid steps when B allows, fits VMEM."""
    w_bufs = 1 if n_j == 1 else 2
    fixed = w_bufs * K * tn * w_itemsize + w_bufs * tn * 4      # weight + bias buffers
    avail = max(budget - fixed, 0)
    Bp8 = _round_up(B, 8)
    tm = min(512, Bp8, max(8, _round_up(_cdiv(Bp8, 4), 8)))     # keep >= ~4 batch steps
    per_row = 2 * K * x_itemsize + 2 * tn * 4                   # 2x-buffered x row + f32 out row
    while tm > 8 and tm * per_row > avail:
        tm = max(8, _round_up(tm // 2, 8))
    # TODO(synk): add a K (reduction) grid axis for extreme embedding_dim where even a
    # tm=8 activation row no longer fits the VMEM budget.
    return tm


# ----------------------------------------------------------------------------- kernel
def _linear_kernel(x_ref, w_ref, b_ref, o_ref):
    # x_ref: (tm, K) bf16   w_ref: (K, tn) bf16   b_ref: (1, tn) f32   o_ref: (tm, tn) f32
    acc = jnp.dot(x_ref[...], w_ref[...], preferred_element_type=jnp.float32)
    o_ref[...] = (acc + b_ref[...]).astype(o_ref.dtype)


def mwe_linear(x, w_t_pad, b2d_pad, *, tm, tn, vmem_limit):
    """x: [Bp, K] (compute dtype), w_t_pad: [K, Np], b2d_pad: [1, Np] -> f32 [Bp, Np]."""
    Bp, K = x.shape
    Np = w_t_pad.shape[1]
    n_i, n_j = Bp // tm, Np // tn
    # Resident (constant-index) weight/bias need only one buffer; double-buffer when tiled.
    wb_mode = pl.Buffered(1) if n_j == 1 else pl.Buffered(2)
    return pl.pallas_call(
        _linear_kernel,
        out_shape=jax.ShapeDtypeStruct((Bp, Np), jnp.float32),
        grid_spec=pltpu.PrefetchScalarGridSpec(
            num_scalar_prefetch=0,
            grid=(n_i, n_j),
            in_specs=[
                # activations: tiled over batch, resident across the (inner) N axis
                pl.BlockSpec((tm, K), lambda i, j: (i, 0)),
                # weight / bias: resident when n_j == 1, else tiled over N
                pl.BlockSpec((K, tn), lambda i, j: (0, j), pipeline_mode=wb_mode),
                pl.BlockSpec((1, tn), lambda i, j: (0, j), pipeline_mode=wb_mode),
            ],
            out_specs=pl.BlockSpec((tm, tn), lambda i, j: (i, j)),
        ),
        compiler_params=pltpu.CompilerParams(
            # No reduction axis: both axes are independent.
            # TODO(synk): verify on v7x whether "parallel" shards across both TensorCores
            # or whether pltpu.CORE_PARALLEL is required for the batch axis.
            dimension_semantics=("parallel", "parallel"),
            vmem_limit_bytes=int(vmem_limit),
        ),
    )(x, w_t_pad, b2d_pad)


# ----------------------------------------------------------------------------- params
def init_params(key, embedding_dim):
    """Deterministic params matching nn.Linear(2E, E) with xavier_normal_ weight."""
    E = embedding_dim
    fan_in, fan_out = 2 * E, E
    k_w, k_b = jax.random.split(key)
    std = (2.0 / (fan_in + fan_out)) ** 0.5                          # xavier_normal_
    w = std * jax.random.normal(k_w, (E, 2 * E), dtype=jnp.float32)  # PyTorch [out, in]
    bound = 1.0 / (fan_in ** 0.5)                                    # default bias init
    b = jax.random.uniform(k_b, (E,), minval=-bound, maxval=bound, dtype=jnp.float32)
    return w, b


def prepare_params(w, b, *, compute_dtype=jnp.bfloat16):
    """One-time prep: transpose to [2E, Np], cast to bf16, zero-pad N to lane multiples."""
    E, K = w.shape                                   # K = 2E (NOT padded: full-dim block)
    w_itemsize = jnp.dtype(compute_dtype).itemsize
    budget = _vmem_limit_bytes() - 2 * _MIB          # planning margin vs. requested limit
    Np, tn = _plan_n_tiling(K, E, w_itemsize, budget)
    w_t_pad = jnp.zeros((K, Np), dtype=compute_dtype).at[:, :E].set(w.T.astype(compute_dtype))
    b2d_pad = jnp.zeros((1, Np), dtype=jnp.float32).at[0, :E].set(b)
    return {
        "w_t_pad": w_t_pad, "b2d_pad": b2d_pad,
        "w": w, "b": b,                              # originals for the tiny-size XLA path
        "E": E, "K": K, "Np": Np, "tn": tn,
        "compute_dtype": compute_dtype,
    }


# ----------------------------------------------------------------------------- forward
def matrix_mwe_model_forward(batch_mwe, mwe_lengths, prepared, *, force_pallas=None):
    """batch_mwe: [B, 2, E]; mwe_lengths unused; prepared: output of prepare_params."""
    del mwe_lengths  # unused by the reference forward pass
    B = batch_mwe.shape[0]
    E, K = prepared["E"], prepared["K"]
    # Row-major flatten of the (2, E) dims == concat(slot0, slot1, axis=1): metadata only.
    x32 = batch_mwe.reshape(B, K)                     # [B, 2E], no K padding

    use_pallas = force_pallas if force_pallas is not None else (B * E >= _XLA_FALLBACK_CUTOFF)
    if not use_pallas:
        # Tiny problems: pallas_call fixed cost + lane padding dominate -> plain XLA dot.
        return x32 @ prepared["w"].T + prepared["b"]

    tn, Np = prepared["tn"], prepared["Np"]
    n_j = Np // tn
    vmem_limit = _vmem_limit_bytes()
    budget = vmem_limit - 2 * _MIB
    x_itemsize = jnp.dtype(prepared["compute_dtype"]).itemsize
    w_itemsize = jnp.dtype(prepared["w_t_pad"].dtype).itemsize
    tm = _pick_tm(B, K, tn, n_j, budget, x_itemsize, w_itemsize)

    x = x32.astype(prepared["compute_dtype"])
    Bp = _round_up(B, tm)
    if Bp != B:
        x = jnp.pad(x, ((0, Bp - B), (0, 0)))         # batch pad only (no K pad)

    y = mwe_linear(x, prepared["w_t_pad"], prepared["b2d_pad"],
                   tm=tm, tn=tn, vmem_limit=vmem_limit)
    return y[:B, :E]


# ----------------------------------------------------------------------------- demo
if __name__ == "__main__":
    key = jax.random.PRNGKey(0)
    k_param, k_x = jax.random.split(key)

    B = 16
    E = 64  # embedding_dim
    w, b = init_params(k_param, E)
    prepared = prepare_params(w, b)                   # one-time (transpose + pad + bf16)

    batch_mwe = jax.random.normal(k_x, (B, 2, E), dtype=jnp.float32)
    mwe_lengths = jnp.full((B,), 2, dtype=jnp.int32)  # unused, kept for signature parity

    # Run the Pallas kernel path explicitly (demo size is below the auto-dispatch cutoff).
    y = matrix_mwe_model_forward(batch_mwe, mwe_lengths, prepared, force_pallas=True)
    y = jax.block_until_ready(y)

    # Reference of the same math with bf16-rounded inputs (kernel computes in bf16, f32 acc).
    x_f32 = batch_mwe.reshape(B, 2 * E)
    x_bf = x_f32.astype(jnp.bfloat16).astype(jnp.float32)
    w_bf = w.astype(jnp.bfloat16).astype(jnp.float32)
    y_ref = x_bf @ w_bf.T + b
    assert y.shape == (B, E)
    assert jnp.allclose(y, y_ref, atol=1e-2, rtol=1e-2)

    # Also exercise the auto-dispatch (tiny size -> XLA fallback) against the f32 reference.
    y_auto = jax.block_until_ready(matrix_mwe_model_forward(batch_mwe, mwe_lengths, prepared))
    assert jnp.allclose(y_auto, x_f32 @ w.T + b, atol=1e-5, rtol=1e-5)

    print("KERNEL_OK")
</pallas_src>

<mosaic_0001>
module attributes {stable_mosaic.version = 11 : i64} {
  func.func @_linear_kernel(%arg0: i32, %arg1: i32, %arg2: memref<8x128xbf16, #tpu.memory_space<vmem>>, %arg3: memref<128x128xbf16, #tpu.memory_space<vmem>>, %arg4: memref<1x128xf32, #tpu.memory_space<vmem>>, %arg5: memref<8x128xf32, #tpu.memory_space<vmem>>) attributes {dimension_semantics = [#tpu.dimension_semantics<parallel>, #tpu.dimension_semantics<parallel>], iteration_bounds = array<i64: 2, 1>, scalar_prefetch = 0 : i64, scratch_operands = 0 : i64, tpu.core_type = #tpu.core_type<tc>, window_params = [{transform_indices = @transform_0, window_bounds = array<i64: 8, 128>}, {pipeline_mode = #tpu.pipeline_mode<synchronous>, transform_indices = @transform_1, window_bounds = array<i64: 128, 128>}, {pipeline_mode = #tpu.pipeline_mode<synchronous>, transform_indices = @transform_2, window_bounds = array<i64: 1, 128>}, {transform_indices = @transform_3, window_bounds = array<i64: 8, 128>}]} {
    %c0 = arith.constant 0 : index
    %c0_0 = arith.constant 0 : index
    %0 = vector.load %arg2[%c0, %c0_0] : memref<8x128xbf16, #tpu.memory_space<vmem>>, vector<8x128xbf16>
    %c0_1 = arith.constant 0 : index
    %c0_2 = arith.constant 0 : index
    %1 = vector.load %arg3[%c0_1, %c0_2] : memref<128x128xbf16, #tpu.memory_space<vmem>>, vector<128x128xbf16>
    %cst = arith.constant dense<0.000000e+00> : vector<8x128xf32>
    %2 = tpu.matmul %0, %1, %cst {dimension_numbers = #tpu.dot_dimension_numbers<[1], [0], [0], [1], [0, 0, 1, 1], [], []>} : vector<8x128xbf16>, vector<128x128xbf16>, vector<8x128xf32> -> vector<8x128xf32>
    %c0_3 = arith.constant 0 : index
    %c0_4 = arith.constant 0 : index
    %3 = vector.load %arg4[%c0_3, %c0_4] : memref<1x128xf32, #tpu.memory_space<vmem>>, vector<1x128xf32>
    %4 = vector.broadcast %3 : vector<1x128xf32> to vector<8x128xf32>
    %5 = arith.addf %2, %4 : vector<8x128xf32>
    %c0_5 = arith.constant 0 : index
    %c0_6 = arith.constant 0 : index
    %6 = vector.load %arg5[%c0_5, %c0_6] : memref<8x128xf32, #tpu.memory_space<vmem>>, vector<8x128xf32>
    tpu.vector_store %arg5[%c0_5, %c0_6], %5 {strides = array<i32>} : memref<8x128xf32, #tpu.memory_space<vmem>>, vector<8x128xf32>,
    return
  }
  func.func @transform_0(%arg0: i32, %arg1: i32) -> (i32, i32) {
    %c0_i32 = arith.constant 0 : i32
    %c0_i32_0 = arith.constant 0 : i32
    return %arg0, %c0_i32 : i32, i32
  }
  func.func @transform_1(%arg0: i32, %arg1: i32) -> (i32, i32) {
    %c0_i32 = arith.constant 0 : i32
    %c0_i32_0 = arith.constant 0 : i32
    return %c0_i32, %arg1 : i32, i32
  }
  func.func @transform_2(%arg0: i32, %arg1: i32) -> (i32, i32) {
    %c0_i32 = arith.constant 0 : i32
    %c0_i32_0 = arith.constant 0 : i32
    return %c0_i32, %arg1 : i32, i32
  }
  func.func @transform_3(%arg0: i32, %arg1: i32) -> (i32, i32) {
    %c0_i32 = arith.constant 0 : i32
    return %arg0, %arg1 : i32, i32
  }
}

</mosaic_0001>

<bundles_post_ra>
// kernel: tpu_custom_call.1
= control target key start
LH: loop header
LB: loop body
LE: loop exit
PB: predicated region body
PF: predicated region fallthrough
CT: control target
= control target key end

     0   :  { %8 = vsyncpa [#allocation3], 0  ;;  %s960_s0 = inlined_call_operand.hbm [shape: bf16[16,128], index: 0, kind: input, shape index: {}]   ;;  %s961_s1 = inlined_call_operand.hbm [shape: bf16[128,128], index: 1, kind: input, shape index: {}]   ;;  %s962_s2 = inlined_call_operand.vmem [shape: f32[1,128], index: 2, kind: input, shape index: {}]   ;;  %s963_s3 = inlined_call_operand.hbm [shape: f32[16,128], index: 3, kind: output, shape index: {}]  }
   0x1   :  { %10 = vsyncpa [#allocation3 + $0x1], 0 }
   0x2   :  { %11 = vsyncpa [#allocation6], 0 }
   0x3   :  { %12 = vsyncpa [#allocation4], 0 }
   0x4   :  { %14 = vsyncpa [#allocation4 + $0x1], 0  ;;  %s774_s12 = smov 0   ;;  %s776_s13 = smov 0  }
   0x5   :  { %s778_s14 = smov 0   ;;  %s780_s15 = smov 0  }
   0x6   :  { %s782_s16 = smov 0   ;;  %s784_s17 = smov 0  }
   0x7 LB: > { %s468_s18 = sadd.s32 4294967295, %s745_s17   ;;  %s469_s19 = sadd.s32 4294967294, %s745_s17   ;;  %s745_s17 = sphi %s784_s17, %s20_s17   ;;  %s741_s16 = sphi %s782_s16, %s981_s16   ;;  %s737_s15 = sphi %s780_s15, %s980_s15   ;;  %s733_s14 = sphi %s778_s14, %s979_s14   ;;  %s729_s13 = sphi %s776_s13, %s978_s13   ;;  %s725_s12 = sphi %s774_s12, %s977_s12  }
   0x8   : > { %p52_p0 = scmp.ne.s32.totalorder %s729_s13, %s725_s12  ;;  %p808_p1 = scmp.eq.s32.totalorder %s468_s18, 0 }
   0x9   : > { %p812_p2 = scmp.eq.s32.totalorder %s468_s18, 1  ;;  %p136_p3 = scmp.eq.s32.totalorder %s469_s19, 1 }
   0xa   : > { %p818_p4 = por %p808_p1, %p52_p0  ;;  %p470_p5 = scmp.ge.s32.totalorder %s745_s17, 1 }
   0xb   : > { %p823_p6 = por %p136_p3, %p52_p0  ;;  %p143_p7 = scmp.lt.s32.totalorder %s745_s17, 3 }
   0xc   : > { %s967_s22 = scalar_select %p818_p4, 1, 0 }
   0xd   : > { %s968_s23 = scalar_select %p823_p6, 1, 0 }
   0xe   : > { %p828_p8 = pnand %p470_p5, %p143_p7  ;;  %s747_s25 = smov [#allocation5]  }
   0xf   : > { %s157_s26 = sshll.u32 %s747_s25, 4  ;;  %s32_s28 = sadd.s32 1, %s741_s16  ;;  %s158_s26 = int_to_ptr.vmem [resolvable:$true] %s157_s26 }
  0x10   : > { %p530_p9 = pneg %p828_p8  ;;  %s618_s29 = scalar_lea.vmem %s158_s26, 1024 }
  0x11   : > { %p619_p13 = scmp.ne.s32.totalorder %s158_s26, %s618_s29  ;;  %p626_p5 = scmp.lt.s32.totalorder %s158_s26, %s158_s26 }
  0x12   : > { %p837_p11 = pnand %p530_p9, %p808_p1  ;;  %p627_p7 = scmp.lt.s32.totalorder %s618_s29, %s618_s29 }
  0x14   : > { %p609_p12 = pneg %p837_p11  ;;  %p628_p6 = por %p627_p7, %p626_p5 }
  0x16   : > { %p621_p0 = pnand %p619_p13, %p609_p12 }
  0x18   : > { %p622_p3 = pneg %p621_p0 }
  0x1a   : > { %p629_p4 = pnand %p628_p6, %p622_p3 }
  0x1c   : > { %632 = shalt.err (!%p629_p4)
}
  0x1d   : > { %s748_s30 = smov 64   ;;  %s749_s4 = smov 4  }
  0x1e   : > { %533 = dma.hbm_to_vmem [thread:$0]  (!%p837_p11), %s961_s1, 1024, %s158_s26, [#allocation6], %s748_s30, %s748_s30, %s749_s4  }
  0x1f   : > { %p34_p6 = scmp.ge.s32.totalorder %s32_s28, 2  ;;  %s39_s7 = sadd.s32 1, %s733_s14 }
  0x20   : > { %p46_p4 = scmp.ne.s32.totalorder %s733_s14, %s729_s13  ;;  %p47_p9 = scmp.eq.s32.totalorder %s745_s17, 0 }
  0x21   : > { %s983_s28 = smov (%p34_p6, %s32_s28), 0  ;;  %p543_p0 = scmp.lt.s32.totalorder %s745_s17, 2 }
  0x22   : > { %p855_p12 = por %p47_p9, %p46_p4  ;;  %p861_p13 = por %p812_p2, %p46_p4 }
  0x23   : > { %s36_s10 = ssub.s32 %s741_s16, %s983_s28  ;;  %s177_s11 = sand.u32 1, %s733_s14  }
  0x24   : > { %p37_p11 = scmp.eq.s32.totalorder %s36_s10, 0  ;;  %s474_s18 = sshll.u32 %s177_s11, 2 }
  0x25   : > { %s475_s25 = sshll.u32 %s741_s16, 6  ;;  %s181_s30 = scalar_lea.vmem [#allocation2], %s474_s18 }
  0x26   : > { %s870_s19 = scalar_select %p37_p11, %s733_s14, %s39_s7  }
  0x27   : > { %s186_s29 = scalar_lea.hbm %s960_s0, %s475_s25  ;;  %s188_s4 = sshll.u32 %s181_s30, 4  ;;  %s189_s4 = int_to_ptr.vmem [resolvable:$true] %s188_s4 }
  0x28   : > { %p878_p2 = pnand %p543_p0, %p855_p12  ;;  %s178_s5 = scalar_lea.sflag [#allocation3], %s177_s11 }
  0x29   : > { %s646_s6 = scalar_lea.vmem %s189_s4, 64  ;;  %s750_s7 = smov [#allocation2]  }
  0x2a   : > { %p635_p3 = pneg %p878_p2  ;;  %p647_p5 = scmp.ne.s32.totalorder %s189_s4, %s646_s6 }
  0x2b   : > { %s651_s10 = sshll.u32 %s750_s7, 4  ;;  %s652_s10 = int_to_ptr.vmem [resolvable:$false] %s651_s10 }
  0x2c   : > { %p649_p7 = pnand %p647_p5, %p635_p3  ;;  %s653_s25 = scalar_lea.vmem %s652_s10, 128 }
  0x2d   : > { %p654_p4 = scmp.lt.s32.totalorder %s189_s4, %s652_s10  ;;  %p655_p9 = scmp.lt.s32.totalorder %s653_s25, %s646_s6 }
  0x2e   : > { %p650_p6 = pneg %p649_p7 }
  0x2f   : > { %p656_p11 = por %p655_p9, %p654_p4 }
  0x31   : > { %p657_p10 = pnand %p656_p11, %p650_p6 }
  0x33   : > { %660 = shalt.err (!%p657_p10)
}
  0x34   : > { %537 = dma.hbm_to_vmem [thread:$0]  (!%p878_p2), %s186_s29, 64, %s189_s4, %s178_s5  }
  0x35   : > { %197 = sbr.rel (%p828_p8) target bundleno = 303 (0x12f), region = 32  ;;  %s889_s8 = sand.u32 (!%p828_p8), 1, %s729_s13  }
  0x36   : > { %s477_s11 = sshll.u32 (!%p828_p8), %s889_s8, 2  ;;  %s200_s18 = scalar_lea.sflag (!%p828_p8), [#allocation3], %s889_s8 }
  0x37   : > { %s893_s26 = scalar_lea.vmem (!%p828_p8), [#allocation2], %s477_s11  ;;  %p974_p12 = scmp.ne.s32.totalorder (!%p828_p8), %s967_s22, 0 }
  0x3a   : > { %712 = dma.done.wait (%p974_p12), %s200_s18, 64  }
  0x3b   : > { %714 = vsyncadd (%p974_p12), %s200_s18, 4294967232 }
  0x3c   : > { %716 = dma.done.wait (%p808_p1), [#allocation6], 1024  }
  0x3d   : > { %718 = vsyncadd (%p808_p1), [#allocation6], 4294966272  ;;  %v751_v0 = vmov 0.0   ;;  %vm752_vm0 = vmmov 0   ;;  %v599_v1 = vld [vmem:[#allocation5 + $0x38] sm:$0xff]   ;;  %v600_v2 = vld [vmem:[#allocation5 + $0x30] sm:$0xff]  }
  0x3e   : > { %502 = vmatprep.subr.bf16.mxu0 %v751_v0  ;;  %518 = vmatprep.mubr.msk.bf16.mxu0 %vm752_vm0, %v751_v0  ;;  %v601_v3 = vld [vmem:[#allocation5 + $0x28] sm:$0xff]   ;;  %v602_v4 = vld [vmem:[#allocation5 + $0x20] sm:$0xff]   ;;  %v603_v5 = vld [vmem:[#allocation5 + $0x18] sm:$0xff]   ;;  %s479_s20 = sshll.u32 %s889_s8, 3  ;;  %s490_s27 = sshll.u32 %s737_s15, 7 }
  0x3f   : > { %503 = vmatpush3.bf16.msra.mxu0 %v599_v1  ;;  %v604_v6 = vld [vmem:[#allocation5 + $0x10] sm:$0xff]   ;;  %v605_v7 = vld [vmem:[#allocation5 + $0x8] sm:$0xff]   ;;  %v606_v8 = vld [vmem:[#allocation5] sm:$0xff]   ;;  %s232_s29 = scalar_lea.vmem [#allocation7], %s479_s20  ;;  %s912_s5 = scalar_lea.hbm %s963_s3, %s490_s27 }
  0x40   : > { %504 = vmatprep.subr.bf16.mxu0 %v751_v0  ;;  %v237_v9 = vld [vmem:[%s893_s26] sm:$0xf]  ;;  %s365_s30 = sshll.u32 %s232_s29, 4  ;;  %s351_s6 = scalar_lea.sflag [#allocation4], %s889_s8  ;;  %s914_s30 = int_to_ptr.vmem [resolvable:$true] %s365_s30 }
  0x41   : > { %v480_v10 = vld [vmem:[%s962_s2] ss:$0 sm:$0xff]  ;;  %s661_s7 = scalar_lea.vmem %s914_s30, 128  ;;  %s753_s15 = smov [#allocation7]  }
  0x42   : > { %p662_p1 = scmp.ne.s32.totalorder %s914_s30, %s661_s7  ;;  %s665_s10 = sshll.u32 %s753_s15, 4  ;;  %s666_s10 = int_to_ptr.vmem [resolvable:$false] %s665_s10 }
  0x43   : > { %505 = vmatpush3.bf16.msra.mxu0 %v600_v2  ;;  %s667_s25 = scalar_lea.vmem %s666_s10, 256  ;;  %p668_p0 = scmp.lt.s32.totalorder %s914_s30, %s666_s10 }
  0x44   : > { %506 = vmatprep.subr.bf16.mxu0 %v751_v0  ;;  %p663_p8 = pnand %p662_p1, %p861_p13  ;;  %p669_p2 = scmp.lt.s32.totalorder %s667_s25, %s661_s7 }
  0x46   : > { %p664_p10 = pneg %p663_p8  ;;  %p670_p3 = por %p669_p2, %p668_p0 }
  0x47   : > { %507 = vmatpush3.bf16.msra.mxu0 %v601_v3 }
  0x48   : > { %508 = vmatprep.subr.bf16.mxu0 %v751_v0  ;;  %p671_p5 = pnand %p670_p3, %p664_p10 }
  0x4b   : > { %509 = vmatpush3.bf16.msra.mxu0 %v602_v4 }
  0x4c   : > { %510 = vmatprep.subr.bf16.mxu0 %v751_v0 }
  0x4f   : > { %511 = vmatpush3.bf16.msra.mxu0 %v603_v5 }
  0x50   : > { %512 = vmatprep.subr.bf16.mxu0 %v751_v0 }
  0x53   : > { %513 = vmatpush3.bf16.msra.mxu0 %v604_v6 }
  0x54   : > { %514 = vmatprep.subr.bf16.mxu0 %v751_v0 }
  0x57   : > { %515 = vmatpush3.bf16.msra.mxu0 %v605_v7 }
  0x58   : > { %516 = vmatprep.subr.bf16.mxu0 %v751_v0 }
  0x5b   : > { %517 = vmatpush3.bf16.msra.mxu0 %v606_v8 }
  0x5e   : > { %519 = vmatmul.mubr.bf16.vlgmr.msra.gmra.mxu0 %v237_v9 }
 0x11e   : > { %v343_v11 = vpop.f32.mrf.mxu0 }
 0x11f   : > { %v344_v12 = vadd.f32 %v480_v10, %v343_v11 }
 0x120   : > { %v520_v13 = vpop.f32.mrf.mxu0 }
 0x121   : > { %349 = vst [vmem:[%s232_s29] sm:$0xff] %v344_v12 }
 0x122   : > { %v346_v14 = vpop.f32.mrf.mxu0 }
 0x123   : > { %674 = shalt.err (!%p671_p5)
}
 0x124   : > { %s675_s11 = scalar_lea.hbm %s912_s5, 128  ;;  %s679_s26 = scalar_lea.hbm %s963_s3, 256 }
 0x125   : > { %p676_p7 = scmp.ne.s32.totalorder %s912_s5, %s675_s11  ;;  %p680_p9 = scmp.lt.s32.totalorder %s912_s5, %s963_s3 }
 0x126   : > { %p681_p11 = scmp.lt.s32.totalorder %s679_s26, %s675_s11 }
 0x127   : > { %p677_p6 = pnand %p676_p7, %p861_p13 }
 0x128   : > { %p682_p12 = por %p681_p11, %p680_p9 }
 0x129   : > { %p678_p4 = pneg %p677_p6 }
 0x12b   : > { %p683_p1 = pnand %p682_p12, %p678_p4 }
 0x12d   : > { %686 = shalt.err (!%p683_p1)
}
 0x12e   : > { %528 = dma.vmem_to_hbm [thread:$0]  (%p861_p13), %s914_s30, 128, %s912_s5, %s351_s6   ;;  %v521_v15 = vpop.f32.mrf.mxu0 }
 0x12f PF: > { %s377_s24 = sand.u32 1, %s725_s12   ;;  %p975_p8 = scmp.ne.s32.totalorder %s968_s23, 0 }
 0x130   : > { %p976_p10 = scmp.ge.s32.totalorder %s745_s17, 2  ;;  %s378_s27 = scalar_lea.sflag [#allocation4], %s377_s24 }
 0x132   : > { %p539_p0 = pnand %p976_p10, %p975_p8 }
 0x134   : > { %p540_p2 = pneg %p539_p0 }
 0x136   : > { %720 = dma.done.wait (%p540_p2), %s378_s27, 128  }
 0x137   : > { %722 = vsyncadd (%p540_p2), %s378_s27, 4294967168  ;;  %s20_s17 = sadd.s32 1, %s745_s17   ;;  %s977_s12 = smov %s729_s13 }
 0x138   : > { %p17_p3 = scmp.ge.s32.totalorder %s20_s17, 4   ;;  %s978_s13 = smov %s733_s14 }
 0x139   : > { %s979_s14 = smov %s870_s19  ;;  %s980_s15 = smov %s741_s16 }
 0x13a   : > { %s981_s16 = smov %s983_s28  ;;  %19 = sbr.rel (!%p17_p3) target bundleno = 7 (0x7), region = 85 }
 0x13f   :  { %383 = vsyncpa [#allocation3], 1 }
 0x140   :  { %385 = vsyncpa [#allocation3 + $0x1], 1 }
 0x141   :  { %386 = vsyncpa [#allocation6], 1 }
 0x142   :  { %387 = vsyncpa [#allocation4], 1 }
 0x143   :  { %389 = vsyncpa [#allocation4 + $0x1], 1 }

</bundles_post_ra>
